<compile_context>
chip_gen: v7x
topology: tpu7x:2x2x1
jax: 0.10.0
libtpu: 0.0.40
codegen_flags: <defaults>
</compile_context>

<pallas_src>
import functools

import jax
import jax.numpy as jnp
import numpy as np
from jax.experimental import pallas as pl
from jax.experimental.pallas import tpu as pltpu


def _round_up(x, m):
    return (x + m - 1) // m * m


def _pace_kernel(x_ref, t_ref, o_ref, *, tile_hw, hw_valid):
    # x_ref: (1, C, tile_hw) logits block, native dtype (C=sublanes, HW=lanes)
    # t_ref: (1, 1, tile_hw) int32 target block
    # o_ref: (1, 1, 8, 128) f32 per-tile partial-sum output block
    x = x_ref[0].astype(jnp.float32)                 # (C, T)
    t = t_ref[0]                                     # (1, T)

    # softplus(x) = logaddexp(x, 0)  (numerically stable)
    sp = jnp.logaddexp(x, 0.0)                       # (C, T)
    denom = jnp.sum(sp, axis=0, keepdims=True)       # (1, T) sum over classes

    # Gather the target-class logit via a one-hot mask over the class axis.
    cls = jax.lax.broadcasted_iota(jnp.int32, x.shape, 0)
    x_t = jnp.sum(jnp.where(cls == t, x, 0.0), axis=0, keepdims=True)  # (1, T)

    # log(softplus(x_t)) stably: softplus(x) ~ exp(x) for x << 0.
    sp_t = jnp.logaddexp(x_t, 0.0)
    log_sp_t = jnp.where(x_t < -30.0, x_t, jnp.log(sp_t))

    # -log(softplus(x_t) / sum_c softplus(x_c)) in log space.
    loss = jnp.log(denom) - log_sp_t                 # (1, T)

    if hw_valid is not None:
        # Mask out padded spatial positions.
        j = pl.program_id(1)
        lane = jax.lax.broadcasted_iota(jnp.int32, loss.shape, 1)
        loss = jnp.where(j * tile_hw + lane < hw_valid, loss, 0.0)

    partial = jnp.sum(loss)                          # scalar f32

    # Write the partial sum into lane 0 of a full (8, 128) output tile
    # (unique block per grid step -> no resident accumulator, fully parallel).
    row = jax.lax.broadcasted_iota(jnp.int32, o_ref.shape, 2)
    col = jax.lax.broadcasted_iota(jnp.int32, o_ref.shape, 3)
    o_ref[...] = jnp.where((row == 0) & (col == 0), partial, 0.0)


def pa_cross_entropy_loss(logits, target, reduction='mean'):
    """Forward pass of PACrossEntropyLoss. logits: (B, C, H, W) or (N, C)."""
    assert reduction in ('mean', 'sum')

    if logits.ndim > 2:
        B, C = logits.shape[0], logits.shape[1]
        HW = 1
        for d in logits.shape[2:]:
            HW *= int(d)
        x3 = logits.reshape(B, C, HW)                  # layout-preserving, free
        t3 = target.reshape(B, 1, HW).astype(jnp.int32)
    else:
        # 2-D (N, C) fallback: classes must land on the sublane axis, so one
        # transpose copy is unavoidable on this (uncommon) path.
        N2, C = logits.shape
        B, HW = 1, int(N2)
        x3 = jnp.transpose(logits, (1, 0)).reshape(1, C, HW)
        t3 = target.reshape(1, 1, HW).astype(jnp.int32)

    n_rows = B * HW
    itemsize = jnp.dtype(logits.dtype).itemsize

    # Lane-tile over the spatial axis: as large as a conservative (v7x-safe)
    # VMEM budget allows, always a multiple of 128.
    budget = 4 * 1024 * 1024  # bytes for one double-buffered logits block
    cap = max(128, min(1024, (budget // (2 * C * max(itemsize, 4))) // 128 * 128))

    if HW % 128 == 0:
        # No padding needed: shrink the tile to a 128-multiple dividing HW.
        tile_hw = min(cap, HW)
        while HW % tile_hw != 0:
            tile_hw -= 128
        hw_pad, hw_valid = HW, None
    else:
        tile_hw = min(cap, _round_up(HW, 128))
        hw_pad = pl.cdiv(HW, tile_hw) * tile_hw
        hw_valid = HW
        # TODO(synk): this pad materializes a copy; only hit when H*W is not a
        # multiple of 128 (padded positions are masked to zero loss in-kernel).
        x3 = jnp.pad(x3, ((0, 0), (0, 0), (0, hw_pad - HW)))
        t3 = jnp.pad(t3, ((0, 0), (0, 0), (0, hw_pad - HW)))

    grid_j = hw_pad // tile_hw
    grid = (B, grid_j)

    kernel = functools.partial(_pace_kernel, tile_hw=tile_hw, hw_valid=hw_valid)

    cost = pl.CostEstimate(
        flops=6 * B * C * hw_pad,
        transcendentals=2 * B * C * hw_pad + 4 * B * hw_pad,
        bytes_accessed=(x3.size * itemsize + t3.size * 4
                        + B * grid_j * 8 * 128 * 4),
    )

    partials = pl.pallas_call(
        kernel,
        out_shape=jax.ShapeDtypeStruct((B, grid_j, 8, 128), jnp.float32),
        grid_spec=pltpu.PrefetchScalarGridSpec(
            num_scalar_prefetch=0,
            grid=grid,
            in_specs=[
                pl.BlockSpec((1, C, tile_hw), lambda b, j: (b, 0, j)),
                pl.BlockSpec((1, 1, tile_hw), lambda b, j: (b, 0, j)),
            ],
            out_specs=pl.BlockSpec((1, 1, 8, 128), lambda b, j: (b, j, 0, 0)),
        ),
        compiler_params=pltpu.CompilerParams(
            dimension_semantics=("parallel", "parallel"),
            vmem_limit_bytes=32 * 1024 * 1024,
        ),
        cost_estimate=cost,
    )(x3, t3)

    total = jnp.sum(partials)   # stage-2 reduction (tiny, plain JAX)
    if reduction == 'mean':
        return total / jnp.float32(n_rows)
    return total


def _reference(logits, target, reduction='mean'):
    """Pure-JAX reference for verification."""
    if logits.ndim > 2:
        B, C = logits.shape[0], logits.shape[1]
        x = logits.reshape(B, C, -1).transpose(0, 2, 1).reshape(-1, C)
    else:
        x = logits
    x = x.astype(jnp.float32)
    t = target.reshape(-1)
    sp = jnp.logaddexp(x, 0.0)
    p = sp / jnp.sum(sp, axis=-1, keepdims=True)
    picked = jnp.take_along_axis(p, t[:, None], axis=1)[:, 0]
    loss = -jnp.log(picked)
    return loss.mean() if reduction == 'mean' else loss.sum()


if __name__ == "__main__":
    key = jax.random.PRNGKey(0)
    k1, k2 = jax.random.split(key)

    B, C, H, W = 2, 4, 16, 16
    logits = jax.random.normal(k1, (B, C, H, W), dtype=jnp.float32)
    target = jax.random.randint(k2, (B, H, W), 0, C, dtype=jnp.int32)

    loss = pa_cross_entropy_loss(logits, target, reduction='mean')
    jax.block_until_ready(loss)
    ref = _reference(logits, target, reduction='mean')
    np.testing.assert_allclose(np.asarray(loss), np.asarray(ref),
                               rtol=1e-5, atol=1e-5)

    loss_sum = pa_cross_entropy_loss(logits, target, reduction='sum')
    jax.block_until_ready(loss_sum)
    ref_sum = _reference(logits, target, reduction='sum')
    np.testing.assert_allclose(np.asarray(loss_sum), np.asarray(ref_sum),
                               rtol=1e-5, atol=1e-4)

    print("KERNEL_OK")
</pallas_src>

<mosaic_0001>
module attributes {stable_mosaic.version = 11 : i64} {
  func.func @_pace_kernel(%arg0: i32, %arg1: i32, %arg2: memref<1x4x256xf32, #tpu.memory_space<vmem>>, %arg3: memref<1x1x256xi32, #tpu.memory_space<vmem>>, %arg4: memref<1x1x8x128xf32, #tpu.memory_space<vmem>>) attributes {dimension_semantics = [#tpu.dimension_semantics<parallel>, #tpu.dimension_semantics<parallel>], iteration_bounds = array<i64: 2, 1>, scalar_prefetch = 0 : i64, scratch_operands = 0 : i64, tpu.core_type = #tpu.core_type<tc>, window_params = [{transform_indices = @transform_0, window_bounds = array<i64: 1, 4, 256>}, {transform_indices = @transform_1, window_bounds = array<i64: 1, 1, 256>}, {transform_indices = @transform_2, window_bounds = array<i64: 1, 1, 8, 128>}]} {
    %c0 = arith.constant 0 : index
    %c0_0 = arith.constant 0 : index
    %c0_1 = arith.constant 0 : index
    %0 = vector.load %arg2[%c0, %c0_0, %c0_1] : memref<1x4x256xf32, #tpu.memory_space<vmem>>, vector<1x4x256xf32>
    %1 = vector.shape_cast %0 : vector<1x4x256xf32> to vector<4x256xf32>
    %c0_2 = arith.constant 0 : index
    %c0_3 = arith.constant 0 : index
    %c0_4 = arith.constant 0 : index
    %2 = vector.load %arg3[%c0_2, %c0_3, %c0_4] : memref<1x1x256xi32, #tpu.memory_space<vmem>>, vector<1x1x256xi32>
    %3 = vector.shape_cast %2 : vector<1x1x256xi32> to vector<1x256xi32>
    %cst = arith.constant 0.000000e+00 : f32
    %4 = vector.broadcast %cst : f32 to vector<4x256xf32>
    %5 = arith.maximumf %1, %4 : vector<4x256xf32>
    %6 = vector.broadcast %cst : f32 to vector<4x256xf32>
    %7 = arith.subf %1, %6 : vector<4x256xf32>
    %8 = arith.cmpf one, %7, %7 : vector<4x256xf32>
    %9 = vector.broadcast %cst : f32 to vector<4x256xf32>
    %10 = arith.addf %1, %9 : vector<4x256xf32>
    %11 = math.absf %7 : vector<4x256xf32>
    %cst_5 = arith.constant 0.000000e+00 : f32
    %12 = vector.broadcast %cst_5 : f32 to vector<4x256xf32>
    %13 = arith.subf %12, %11 : vector<4x256xf32>
    %14 = math.exp %13 : vector<4x256xf32>
    %15 = math.log1p %14 : vector<4x256xf32>
    %16 = arith.addf %5, %15 : vector<4x256xf32>
    %17 = arith.select %8, %10, %16 : vector<4x256xi1>, vector<4x256xf32>
    %cst_6 = arith.constant dense<0.000000e+00> : vector<256xf32>
    %18 = vector.multi_reduction <add>, %17, %cst_6 [0] : vector<4x256xf32> to vector<256xf32>
    %19 = vector.shape_cast %18 : vector<256xf32> to vector<1x256xf32>
    %20 = tpu.iota {dimensions = array<i32: 0>} : vector<4x256xi32>
    %21 = vector.broadcast %3 : vector<1x256xi32> to vector<4x256xi32>
    %22 = arith.cmpi eq, %20, %21 : vector<4x256xi32>
    %cst_7 = arith.constant 0.000000e+00 : f32
    %23 = vector.broadcast %cst_7 : f32 to vector<4x256xf32>
    %24 = arith.select %22, %1, %23 : vector<4x256xi1>, vector<4x256xf32>
    %cst_8 = arith.constant dense<0.000000e+00> : vector<256xf32>
    %25 = vector.multi_reduction <add>, %24, %cst_8 [0] : vector<4x256xf32> to vector<256xf32>
    %26 = vector.shape_cast %25 : vector<256xf32> to vector<1x256xf32>
    %cst_9 = arith.constant 0.000000e+00 : f32
    %27 = vector.broadcast %cst_9 : f32 to vector<1x256xf32>
    %28 = arith.maximumf %26, %27 : vector<1x256xf32>
    %29 = vector.broadcast %cst_9 : f32 to vector<1x256xf32>
    %30 = arith.subf %26, %29 : vector<1x256xf32>
    %31 = arith.cmpf one, %30, %30 : vector<1x256xf32>
    %32 = vector.broadcast %cst_9 : f32 to vector<1x256xf32>
    %33 = arith.addf %26, %32 : vector<1x256xf32>
    %34 = math.absf %30 : vector<1x256xf32>
    %cst_10 = arith.constant 0.000000e+00 : f32
    %35 = vector.broadcast %cst_10 : f32 to vector<1x256xf32>
    %36 = arith.subf %35, %34 : vector<1x256xf32>
    %37 = math.exp %36 : vector<1x256xf32>
    %38 = math.log1p %37 : vector<1x256xf32>
    %39 = arith.addf %28, %38 : vector<1x256xf32>
    %40 = arith.select %31, %33, %39 : vector<1x256xi1>, vector<1x256xf32>
    %cst_11 = arith.constant -3.000000e+01 : f32
    %41 = vector.broadcast %cst_11 : f32 to vector<1x256xf32>
    %42 = arith.cmpf olt, %26, %41 : vector<1x256xf32>
    %43 = math.log %40 : vector<1x256xf32>
    %44 = arith.select %42, %26, %43 : vector<1x256xi1>, vector<1x256xf32>
    %45 = math.log %19 : vector<1x256xf32>
    %46 = arith.subf %45, %44 : vector<1x256xf32>
    %47 = vector.shape_cast %46 : vector<1x256xf32> to vector<1x1x256xf32>
    %cst_12 = arith.constant dense<0.000000e+00> : vector<1xf32>
    %48 = vector.multi_reduction <add>, %47, %cst_12 [1, 2] : vector<1x1x256xf32> to vector<1xf32>
    %49 = vector.shape_cast %48 : vector<1xf32> to vector<1x1x1xf32>
    %50 = vector.extract %49[0, 0, 0] : f32 from vector<1x1x1xf32>
    %51 = tpu.iota {dimensions = array<i32: 2>} : vector<1x1x8x128xi32>
    %52 = tpu.iota {dimensions = array<i32: 3>} : vector<1x1x8x128xi32>
    %c0_i32 = arith.constant 0 : i32
    %53 = vector.broadcast %c0_i32 : i32 to vector<1x1x8x128xi32>
    %54 = arith.cmpi eq, %51, %53 : vector<1x1x8x128xi32>
    %c0_i32_13 = arith.constant 0 : i32
    %55 = vector.broadcast %c0_i32_13 : i32 to vector<1x1x8x128xi32>
    %56 = arith.cmpi eq, %52, %55 : vector<1x1x8x128xi32>
    %57 = arith.andi %54, %56 : vector<1x1x8x128xi1>
    %cst_14 = arith.constant 0.000000e+00 : f32
    %58 = vector.broadcast %50 : f32 to vector<1x1x8x128xf32>
    %59 = vector.broadcast %cst_14 : f32 to vector<1x1x8x128xf32>
    %60 = arith.select %57, %58, %59 : vector<1x1x8x128xi1>, vector<1x1x8x128xf32>
    %c0_15 = arith.constant 0 : index
    %c0_16 = arith.constant 0 : index
    %c0_17 = arith.constant 0 : index
    %c0_18 = arith.constant 0 : index
    %61 = vector.load %arg4[%c0_15, %c0_16, %c0_17, %c0_18] : memref<1x1x8x128xf32, #tpu.memory_space<vmem>>, vector<1x1x8x128xf32>
    tpu.vector_store %arg4[%c0_15, %c0_16, %c0_17, %c0_18], %60 {strides = array<i32>} : memref<1x1x8x128xf32, #tpu.memory_space<vmem>>, vector<1x1x8x128xf32>,
    return
  }
  func.func @transform_0(%arg0: i32, %arg1: i32) -> (i32, i32, i32) {
    %c0_i32 = arith.constant 0 : i32
    %c0_i32_0 = arith.constant 0 : i32
    return %arg0, %c0_i32, %arg1 : i32, i32, i32
  }
  func.func @transform_1(%arg0: i32, %arg1: i32) -> (i32, i32, i32) {
    %c0_i32 = arith.constant 0 : i32
    %c0_i32_0 = arith.constant 0 : i32
    return %arg0, %c0_i32, %arg1 : i32, i32, i32
  }
  func.func @transform_2(%arg0: i32, %arg1: i32) -> (i32, i32, i32, i32) {
    %c0_i32 = arith.constant 0 : i32
    %c0_i32_0 = arith.constant 0 : i32
    %c0_i32_1 = arith.constant 0 : i32
    return %arg0, %arg1, %c0_i32, %c0_i32_0 : i32, i32, i32, i32
  }
}

</mosaic_0001>

<bundles_post_ra>
// kernel: tpu_custom_call.1
= control target key start
LH: loop header
LB: loop body
LE: loop exit
PB: predicated region body
PF: predicated region fallthrough
CT: control target
= control target key end

     0   :  { %7 = vsyncpa [#allocation3], 0  ;;  %s1011_s0 = inlined_call_operand.hbm [shape: f32[2,4,256], index: 0, kind: input, shape index: {}]   ;;  %s1012_s1 = inlined_call_operand.hbm [shape: s32[2,1,256], index: 1, kind: input, shape index: {}]   ;;  %s1013_s2 = inlined_call_operand.hbm [shape: f32[2,1,8,128], index: 2, kind: output, shape index: {}]  }
   0x1   :  { %9 = vsyncpa [#allocation3 + $0x1], 0 }
   0x2   :  { %10 = vsyncpa [#allocation6], 0 }
   0x3   :  { %12 = vsyncpa [#allocation6 + $0x1], 0 }
   0x4   :  { %13 = vsyncpa [#allocation4], 0 }
   0x5   :  { %15 = vsyncpa [#allocation4 + $0x1], 0  ;;  %s761_s9 = smov 0   ;;  %s763_s10 = smov 0  }
   0x6   :  { %s765_s11 = smov 0   ;;  %s767_s12 = smov 0  }
   0x7   :  { %s769_s13 = smov 0   ;;  %s771_s14 = smov 0  }
   0x8 LB: > { %s485_s15 = sadd.s32 4294967295, %s741_s14   ;;  %s486_s16 = sadd.s32 4294967294, %s741_s14   ;;  %s741_s14 = sphi %s771_s14, %s21_s14   ;;  %s737_s13 = sphi %s769_s13, %s1033_s13   ;;  %s733_s12 = sphi %s767_s12, %s1032_s12   ;;  %s729_s11 = sphi %s765_s11, %s1031_s11   ;;  %s725_s10 = sphi %s763_s10, %s1030_s10   ;;  %s721_s9 = sphi %s761_s9, %s1029_s9  }
   0x9   : > { %s33_s17 = sadd.s32 1, %s737_s13  ;;  %s42_s18 = sadd.s32 1, %s729_s11 }
   0xa   : > { %p35_p0 = scmp.ge.s32.totalorder %s33_s17, 2  ;;  %p49_p1 = scmp.ne.s32.totalorder %s729_s11, %s725_s10 }
   0xb   : > { %p50_p2 = scmp.eq.s32.totalorder %s741_s14, 0  ;;  %p55_p3 = scmp.ne.s32.totalorder %s725_s10, %s721_s9 }
   0xc   : > { %s1035_s17 = smov (%p35_p0, %s33_s17), 0  ;;  %p56_p5 = scmp.eq.s32.totalorder %s485_s15, 0 }
   0xd   : > { %p802_p4 = por %p50_p2, %p49_p1  ;;  %s37_s20 = ssub.s32 %s737_s13, %s1035_s17 }
   0xe   : > { %p109_p6 = scmp.eq.s32.totalorder %s485_s15, 1  ;;  %p40_p7 = scmp.eq.s32.totalorder %s37_s20, 0 }
   0xf   : > { %p808_p8 = por %p56_p5, %p55_p3  ;;  %p115_p10 = scmp.eq.s32.totalorder %s486_s16, 1 }
  0x10   : > { %p812_p9 = por %p109_p6, %p49_p1  ;;  %p524_p13 = scmp.lt.s32.totalorder %s741_s14, 2 }
  0x11   : > { %s1017_s21 = scalar_select %p808_p8, 1, 0 }
  0x12   : > { %s1018_s22 = scalar_select %p812_p9, 1, 0 }
  0x13   : > { %s817_s23 = scalar_select %p40_p7, %s729_s11, %s42_s18  }
  0x14   : > { %p819_p11 = por %p115_p10, %p55_p3  ;;  %s826_s25 = sand.u32 1, %s729_s11  }
  0x15   : > { %s489_s26 = sshll.u32 %s826_s25, 3  ;;  %s503_s27 = sshll.u32 %s737_s13, 7 }
  0x16   : > { %s1019_s24 = scalar_select %p819_p11, 1, 0 }
  0x17   : > { %s833_s30 = scalar_lea.hbm %s1011_s0, %s503_s27  ;;  %s139_s3 = scalar_lea.vmem [#allocation2], %s489_s26 }
  0x18   : > { %s149_s4 = sshll.u32 %s139_s3, 4  ;;  %p839_p0 = pnand %p524_p13, %p802_p4  ;;  %s835_s4 = int_to_ptr.vmem [resolvable:$true] %s149_s4 }
  0x19   : > { %s136_s6 = scalar_lea.sflag [#allocation3], %s826_s25  ;;  %s595_s7 = scalar_lea.hbm %s833_s30, 128 }
  0x1a   : > { %p596_p3 = scmp.ne.s32.totalorder %s833_s30, %s595_s7  ;;  %p597_p5 = pneg %p839_p0 }
  0x1b   : > { %s600_s16 = scalar_lea.hbm %s1011_s0, 256  ;;  %p601_p4 = scmp.lt.u32.totalorder %s833_s30, %s1011_s0 }
  0x1c   : > { %p598_p6 = pnand %p597_p5, %p596_p3  ;;  %p602_p10 = scmp.lt.u32.totalorder %s600_s16, %s595_s7 }
  0x1d   : > { %p604_p12 = scmp.lt.u32.totalorder %s595_s7, %s833_s30 }
  0x1e   : > { %p599_p7 = pneg %p598_p6  ;;  %p603_p13 = por %p602_p10, %p601_p4 }
  0x20   : > { %p605_p1 = por %p604_p12, %p603_p13 }
  0x22   : > { %p606_p2 = pnand %p605_p1, %p599_p7 }
  0x24   : > { %609 = shalt.err (!%p606_p2)
}
  0x25   : > { %s610_s20 = scalar_lea.vmem %s835_s4, 128  ;;  %s743_s26 = smov [#allocation2]  }
  0x26   : > { %p611_p3 = scmp.ne.s32.totalorder %s835_s4, %s610_s20  ;;  %s615_s27 = sshll.u32 %s743_s26, 4  ;;  %s616_s27 = int_to_ptr.vmem [resolvable:$false] %s615_s27 }
  0x27   : > { %s617_s28 = scalar_lea.vmem %s616_s27, 256  ;;  %p618_p9 = scmp.lt.s32.totalorder %s835_s4, %s616_s27 }
  0x28   : > { %p613_p6 = pnand %p611_p3, %p597_p5  ;;  %p619_p4 = scmp.lt.s32.totalorder %s617_s28, %s610_s20 }
  0x2a   : > { %p614_p11 = pneg %p613_p6  ;;  %p620_p10 = por %p619_p4, %p618_p9 }
  0x2c   : > { %p621_p12 = pnand %p620_p10, %p614_p11 }
  0x2e   : > { %624 = shalt.err (!%p621_p12)
}
  0x2f   : > { %516 = dma.hbm_to_vmem [thread:$0]  (!%p839_p0), %s833_s30, 128, %s835_s4, %s136_s6  }
  0x30   : > { %p1021_p1 = scmp.lt.s32.totalorder %s741_s14, 3  ;;  %p1022_p2 = scmp.ge.s32.totalorder %s741_s14, 1 }
  0x31   : > { %s492_s3 = sshll.u32 %s826_s25, 1  ;;  %s504_s7 = sshll.u32 %s737_s13, 5 }
  0x32   : > { %p875_p7 = pnand %p1022_p2, %p1021_p1  ;;  %s884_s16 = scalar_lea.hbm %s1012_s1, %s504_s7 }
  0x33   : > { %s160_s18 = scalar_lea.vmem [#allocation5], %s492_s3  ;;  %s157_s30 = scalar_lea.sflag [#allocation6], %s826_s25 }
  0x34   : > { %s1023_s29 = scalar_select %p875_p7, 1, 0 }
  0x35   : > { %s170_s19 = sshll.u32 %s160_s18, 4  ;;  %s625_s4 = scalar_lea.hbm %s884_s16, 32  ;;  %s171_s19 = int_to_ptr.vmem [resolvable:$true] %s170_s19 }
  0x36   : > { %p626_p9 = scmp.ne.s32.totalorder %s884_s16, %s625_s4  ;;  %s630_s26 = scalar_lea.hbm %s1012_s1, 64 }
  0x37   : > { %p631_p3 = scmp.lt.u32.totalorder %s884_s16, %s1012_s1  ;;  %p632_p6 = scmp.lt.u32.totalorder %s630_s26, %s625_s4 }
  0x38   : > { %p628_p11 = pnand %p626_p9, %p597_p5  ;;  %p634_p10 = scmp.lt.u32.totalorder %s625_s4, %s884_s16 }
  0x39   : > { %p633_p4 = por %p632_p6, %p631_p3 }
  0x3a   : > { %p629_p13 = pneg %p628_p11 }
  0x3b   : > { %p635_p12 = por %p634_p10, %p633_p4 }
  0x3d   : > { %p636_p1 = pnand %p635_p12, %p629_p13 }
  0x3f   : > { %639 = shalt.err (!%p636_p1)
}
  0x40   : > { %s640_s25 = scalar_lea.vmem %s171_s19, 32  ;;  %s744_s3 = smov [#allocation5]  }
  0x41   : > { %p641_p2 = scmp.ne.s32.totalorder %s171_s19, %s640_s25  ;;  %s645_s7 = sshll.u32 %s744_s3, 4  ;;  %s646_s7 = int_to_ptr.vmem [resolvable:$false] %s645_s7 }
  0x42   : > { %s647_s8 = scalar_lea.vmem %s646_s7, 64  ;;  %p648_p8 = scmp.lt.s32.totalorder %s171_s19, %s646_s7 }
  0x43   : > { %p643_p9 = pnand %p641_p2, %p597_p5  ;;  %p649_p7 = scmp.lt.s32.totalorder %s647_s8, %s640_s25 }
  0x45   : > { %p644_p11 = pneg %p643_p9  ;;  %p650_p3 = por %p649_p7, %p648_p8 }
  0x47   : > { %p651_p6 = pnand %p650_p3, %p644_p11 }
  0x49   : > { %654 = shalt.err (!%p651_p6)
}
  0x4a   : > { %519 = dma.hbm_to_vmem [thread:$0]  (!%p839_p0), %s884_s16, 32, %s171_s19, %s157_s30  }
  0x4b   : > { %p1024_p13 = scmp.ne.s32.totalorder %s1023_s29, 0 }
  0x4c   : > { %s909_s15 = sand.u32 (!%p1024_p13), 1, %s725_s10   ;;  %p1025_p8 = scmp.ne.s32.totalorder (!%p1024_p13), %s1017_s21, 0 }
  0x4d   : > { %179 = sbr.rel (%p1024_p13) target bundleno = 387 (0x183), region = 28  ;;  %s496_s18 = sshll.u32 (!%p1024_p13), %s909_s15, 3 }
  0x4e   : > { %s182_s4 = scalar_lea.sflag (!%p1024_p13), [#allocation3], %s909_s15  ;;  %s185_s6 = scalar_lea.vmem (!%p1024_p13), [#allocation2], %s496_s18 }
  0x54   : > { %708 = dma.done.wait (%p1025_p8), %s182_s4, 128  }
  0x55   : > { %710 = vsyncadd (%p1025_p8), %s182_s4, 4294967168  ;;  %s497_s5 = sshll.u32 %s909_s15, 1  ;;  %s191_s29 = scalar_lea.sflag [#allocation6], %s909_s15 }
  0x56   : > { %s194_s16 = scalar_lea.vmem [#allocation5], %s497_s5 }
  0x57   : > { %712 = dma.done.wait (%p1025_p8), %s191_s29, 32  }
  0x58   : > { %714 = vsyncadd (%p1025_p8), %s191_s29, 4294967264  ;;  %v260_v0 = vlaneseq  ;;  %v222_v4 = vld [vmem:[%s185_s6] sm:$0xff]  ;;  %v223_v5 = vld [vmem:[%s194_s16] sm:$0x3]  ;;  %vm245_vm0 = vcmask 1043456   ;;  %vm341_vm11 = vcmask 1040384  }
  0x59   : > { %v227_v6 = vand.u32 2147483647, %v222_v4  ;;  %v273_v9 = vcombine.high %v222_v4, %v222_v4  ;;  %v224_v41 = vmax.f32 %v222_v4, 0.0  ;;  %vm225_vm4 = vcmp.ne.f32.partialorder %v222_v4, %v222_v4  ;;  %s500_s21 = sshll.u32 %s733_s12, 7  ;;  %s219_s19 = scalar_lea.vmem [#allocation7], %s496_s18 }
  0x5a   : > { %v926_v1 = vshrl.u32 %v260_v0, 7  ;;  %s377_s30 = sshll.u32 %s219_s19, 4  ;;  %s962_s28 = scalar_lea.hbm %s1013_s2, %s500_s21  ;;  %s964_s30 = int_to_ptr.vmem [resolvable:$true] %s377_s30 }
  0x5b   : > { %v228_v10 = vsub.f32 0.0, %v227_v6  ;;  %s363_s25 = scalar_lea.sflag [#allocation4], %s909_s15  ;;  %s655_s12 = scalar_lea.vmem %s964_s30, 128 }
  0x5c   : > { %v264_v2 = vsub.s32 0, %v926_v1  ;;  %v268_v3 = vsub.s32 1, %v926_v1  ;;  %vm356_vm12 = vcmp.eq.s32.totalorder %v926_v1, 0  ;;  %p656_p0 = scmp.ne.s32.totalorder %s964_s30, %s655_s12  ;;  %p1026_p5 = scmp.ne.s32.totalorder %s1018_s22, 0 }
  0x5d   : > { %v229_v12 = vmul.f32 1.442695, %v228_v10  ;;  %s745_s3 = smov [#allocation7]  }
  0x5e   : > { %v265_v7 = vrot.slane %v223_v5, %v264_v2  ;;  %v269_v8 = vrot.slane %v223_v5, %v268_v3  ;;  %p657_p7 = pnand %p656_p0, %p1026_p5  ;;  %s659_s7 = sshll.u32 %s745_s3, 4  ;;  %s660_s7 = int_to_ptr.vmem [resolvable:$false] %s659_s7 }
  0x5f   : > { %575 = vpow2.f32 %v229_v12  ;;  %s661_s8 = scalar_lea.vmem %s660_s7, 256  ;;  %p662_p10 = scmp.lt.s32.totalorder %s964_s30, %s660_s7 }
  0x60   : > { %vm270_vm1 = vcmp.eq.s32.totalorder %v926_v1, %v265_v7  ;;  %vm271_vm2 = vcmp.eq.s32.totalorder %v926_v1, %v269_v8  ;;  %p658_p4 = pneg %p657_p7  ;;  %p663_p12 = scmp.lt.s32.totalorder %s661_s8, %s655_s12 }
  0x61   : > { %v275_v11 = vsel %vm270_vm1, %v222_v4, 0.0  ;;  %v276_v13 = vsel %vm271_vm2, %v273_v9, 0.0 }
  0x62   : > { %v277_v14 = vsel %vm245_vm0, %v275_v11, 0.0  ;;  %v284_v16 = vsel %vm245_vm0, %v276_v13, 0.0  ;;  %p664_p1 = por %p663_p12, %p662_p10 }
  0x63   : > { %v278_v15 = vrot.slane %v277_v14, 4  ;;  %v285_v17 = vrot.slane %v284_v16, 4 }
  0x64   : > { %p665_p2 = pnand %p664_p1, %p658_p4 }
  0x65   : > { %v279_v18 = vadd.f32 %v278_v15, %v277_v14  ;;  %v286_v19 = vadd.f32 %v285_v17, %v284_v16 }
  0x67   : > { %v280_v20 = vrot.slane %v279_v18, 2  ;;  %v287_v21 = vrot.slane %v286_v19, 2 }
  0x69   : > { %v281_v22 = vadd.f32 %v280_v20, %v279_v18  ;;  %v288_v23 = vadd.f32 %v287_v21, %v286_v19  ;;  %v576_v27 = vpop.eup %575 }
  0x6a   : > { %v231_v29 = vadd.f32 1.0, %v576_v27  ;;  %v234_v32 = vmul.f32 -0.5, %v576_v27  ;;  %v237_v38 = vand.u32 2147483647, %v576_v27 }
  0x6b   : > { %v282_v24 = vrot.slane %v281_v22, 1  ;;  %v289_v25 = vrot.slane %v288_v23, 1 }
  0x6c   : > { %577 = vlog2.f32 %v231_v29  ;;  %v235_v37 = vadd.f32 1.0, %v234_v32  ;;  %vm238_vm3 = vcmp.lt.f32.partialorder %v237_v38, 0.0004427343 }
  0x6d   : > { %v934_v26 = vadd.f32 %v282_v24, %v281_v22  ;;  %v936_v28 = vadd.f32 %v289_v25, %v288_v23 }
  0x6e   : > { %v236_v39 = vmul.f32 %v576_v27, %v235_v37 }
  0x6f   : > { %v297_v30 = vand.u32 2147483647, %v934_v26  ;;  %v298_v31 = vand.u32 2147483647, %v936_v28  ;;  %v291_v6 = vmax.f32 %v934_v26, 0.0  ;;  %v292_v13 = vmax.f32 %v936_v28, 0.0 }
  0x70   : > { %vm293_vm7 = vcmp.ne.f32.partialorder %v934_v26, %v934_v26  ;;  %vm294_vm8 = vcmp.ne.f32.partialorder %v936_v28, %v936_v28  ;;  %vm327_vm9 = vcmp.lt.f32.partialorder %v934_v26, -30.0  ;;  %vm328_vm10 = vcmp.lt.f32.partialorder %v936_v28, -30.0 }
  0x71   : > { %v299_v33 = vsub.f32 0.0, %v297_v30  ;;  %v300_v34 = vsub.f32 0.0, %v298_v31 }
  0x73   : > { %v301_v35 = vmul.f32 1.442695, %v299_v33  ;;  %v303_v36 = vmul.f32 1.442695, %v300_v34 }
  0x75   : > { %579 = vpow2.f32 %v301_v35 }
  0x76   : > { %581 = vpow2.f32 %v303_v36  ;;  %v578_v40 = vpop.eup %577 }
  0x77   : > { %v233_v42 = vmul.f32 0.6931472, %v578_v40 }
  0x79   : > { %v239_v43 = vsel %vm238_vm3, %v236_v39, %v233_v42 }
  0x7a   : > { %v240_v44 = vadd.f32 %v239_v43, %v224_v41 }
  0x7c   : > { %v241_v47 = vsel %vm225_vm4, %v222_v4, %v240_v44 }
  0x7d   : > { %v243_v49 = vcombine.high %v241_v47, %v241_v47  ;;  %v246_v50 = vsel %vm245_vm0, %v241_v47, 0.0 }
  0x7e   : > { %v247_v52 = vrot.slane %v246_v50, 4 }
  0x7f   : > { %v580_v45 = vpop.eup %579  ;;  %v253_v53 = vsel %vm245_vm0, %v243_v49, 0.0 }
  0x80   : > { %v582_v46 = vpop.eup %581  ;;  %v305_v48 = vadd.f32 1.0, %v580_v45  ;;  %v308_v54 = vmul.f32 -0.5, %v580_v45  ;;  %v248_v55 = vadd.f32 %v247_v52, %v246_v50  ;;  %v254_v56 = vrot.slane %v253_v53, 4 }
  0x81   : > { %v314_v51 = vadd.f32 1.0, %v582_v46  ;;  %v317_v57 = vmul.f32 -0.5, %v582_v46  ;;  %v311_v63 = vand.u32 2147483647, %v580_v45  ;;  %v320_v3 = vand.u32 2147483647, %v582_v46 }
  0x82   : > { %583 = vlog2.f32 %v305_v48  ;;  %v249_v58 = vrot.slane %v248_v55, 2  ;;  %v255_v59 = vadd.f32 %v254_v56, %v253_v53  ;;  %v309_v60 = vadd.f32 1.0, %v308_v54 }
  0x83   : > { %585 = vlog2.f32 %v314_v51  ;;  %v318_v2 = vadd.f32 1.0, %v317_v57  ;;  %vm312_vm5 = vcmp.lt.f32.partialorder %v311_v63, 0.0004427343  ;;  %vm321_vm6 = vcmp.lt.f32.partialorder %v320_v3, 0.0004427343 }
  0x84   : > { %v250_v61 = vadd.f32 %v249_v58, %v248_v55  ;;  %v256_v62 = vrot.slane %v255_v59, 2  ;;  %v310_v7 = vmul.f32 %v580_v45, %v309_v60 }
  0x85   : > { %v319_v11 = vmul.f32 %v582_v46, %v318_v2 }
  0x86   : > { %v251_v4 = vrot.slane %v250_v61, 1  ;;  %v257_v5 = vadd.f32 %v256_v62, %v255_v59 }
  0x88   : > { %v252_v9 = vadd.f32 %v251_v4, %v250_v61  ;;  %v258_v10 = vrot.slane %v257_v5, 1 }
  0x8a   : > { %v259_v15 = vadd.f32 %v258_v10, %v257_v5  ;;  %587 = vlog2.f32 %v252_v9 }
  0x8c   : > { %v584_v8 = vpop.eup %583  ;;  %589 = vlog2.f32 %v259_v15 }
  0x8d   : > { %v586_v12 = vpop.eup %585  ;;  %v307_v14 = vmul.f32 0.6931472, %v584_v8 }
  0x8e   : > { %v316_v16 = vmul.f32 0.6931472, %v586_v12 }
  0x8f   : > { %v313_v17 = vsel %vm312_vm5, %v310_v7, %v307_v14 }
  0x90   : > { %v322_v18 = vsel %vm321_vm6, %v319_v11, %v316_v16  ;;  %v323_v19 = vadd.f32 %v313_v17, %v291_v6 }
  0x91   : > { %v324_v20 = vadd.f32 %v322_v18, %v292_v13 }
  0x92   : > { %v325_v21 = vsel %vm293_vm7, %v934_v26, %v323_v19 }
  0x93   : > { %v326_v22 = vsel %vm294_vm8, %v936_v28, %v324_v20  ;;  %591 = vlog2.f32 %v325_v21 }
  0x94   : > { %593 = vlog2.f32 %v326_v22  ;;  %v588_v23 = vpop.eup %587 }
  0x95   : > { %v336_v27 = vmul.f32 0.6931472, %v588_v23 }
  0x96   : > { %v590_v24 = vpop.eup %589 }
  0x97   : > { %v338_v31 = vmul.f32 0.6931472, %v590_v24 }
  0x9d   : > { %v592_v25 = vpop.eup %591 }
  0x9e   : > { %v594_v29 = vpop.eup %593  ;;  %v330_v30 = vmul.f32 0.6931472, %v592_v25 }
  0x9f   : > { %v332_v32 = vmul.f32 0.6931472, %v594_v29 }
  0xa0   : > { %v333_v33 = vsel %vm327_vm9, %v934_v26, %v330_v30  ;;  %v355_v26 = vand.u32 127, %v260_v0 }
  0xa1   : > { %v334_v34 = vsel %vm328_vm10, %v936_v28, %v332_v32  ;;  %v339_v35 = vsub.f32 %v336_v27, %v333_v33 }
  0xa2   : > { %v340_v36 = vsub.f32 %v338_v31, %v334_v34  ;;  %vm357_vm13 = vcmp.eq.s32.totalorder %v355_v26, 0 }
  0xa3   : > { %v342_v37 = vsel %vm341_vm11, %v339_v35, 0.0  ;;  %vm358_vm14 = vmand %vm356_vm12, %vm357_vm13 }
  0xa4   : > { %v343_v38 = vsel %vm341_vm11, %v340_v36, 0.0 }
  0xa5   : > { %v344_v39 = vadd.f32 %v343_v38, %v342_v37 }
  0xa7   : > { %345 = vadd.xlane.f32.xlu0 %v344_v39 }
 0x134   : > { %v346_v40 = vpop.xlane.xlu0 %345 }
 0x135   : > { %v347_v41 = vrot.slane %v346_v40, 4 }
 0x137   : > { %v348_v42 = vadd.f32 %v347_v41, %v346_v40 }
 0x139   : > { %v349_v43 = vrot.slane %v348_v42, 2 }
 0x13b   : > { %v350_v44 = vadd.f32 %v349_v43, %v348_v42 }
 0x13d   : > { %v351_v45 = vrot.slane %v350_v44, 1 }
 0x13f   : > { %v352_v46 = vadd.f32 %v351_v45, %v350_v44 }
 0x141   : > { %505 = vpush %v352_v46 }
 0x172   : > { %s506_s20 = spop %505 }
 0x173   : > { %v359_v28 = vstv %s506_s20 }
 0x174   : > { %v360_v0 = vsel %vm358_vm14, %v359_v28, 0.0 }
 0x175   : > { %361 = vst [vmem:[%s219_s19] sm:$0xff] %v360_v0 }
 0x176   : > { %668 = shalt.err (!%p665_p2)
}
 0x177   : > { %s669_s15 = scalar_lea.hbm %s962_s28, 128  ;;  %s673_s6 = scalar_lea.hbm %s1013_s2, 256 }
 0x178   : > { %p670_p9 = scmp.ne.s32.totalorder %s962_s28, %s669_s15  ;;  %p674_p6 = scmp.lt.u32.totalorder %s962_s28, %s1013_s2 }
 0x179   : > { %p675_p13 = scmp.lt.u32.totalorder %s673_s6, %s669_s15  ;;  %p677_p0 = scmp.lt.u32.totalorder %s669_s15, %s962_s28 }
 0x17a   : > { %p671_p11 = pnand %p670_p9, %p1026_p5 }
 0x17b   : > { %p676_p8 = por %p675_p13, %p674_p6 }
 0x17c   : > { %p672_p3 = pneg %p671_p11 }
 0x17d   : > { %p678_p7 = por %p677_p0, %p676_p8 }
 0x17f   : > { %p679_p4 = pnand %p678_p7, %p672_p3 }
 0x181   : > { %682 = shalt.err (!%p679_p4)
}
 0x182   : > { %511 = dma.vmem_to_hbm [thread:$0]  (%p1026_p5), %s964_s30, 128, %s962_s28, %s363_s25  }
 0x183 PF: > { %s389_s16 = sand.u32 1, %s721_s9   ;;  %p1027_p10 = scmp.ne.s32.totalorder %s1019_s24, 0 }
 0x184   : > { %p1028_p12 = scmp.ge.s32.totalorder %s741_s14, 2  ;;  %s390_s21 = scalar_lea.sflag [#allocation4], %s389_s16 }
 0x186   : > { %p521_p1 = pnand %p1028_p12, %p1027_p10 }
 0x188   : > { %716 = dma.done.wait (!%p521_p1), %s390_s21, 128  }
 0x189   : > { %718 = vsyncadd (!%p521_p1), %s390_s21, 4294967168  ;;  %s21_s14 = sadd.s32 1, %s741_s14   ;;  %s1029_s9 = smov %s725_s10 }
 0x18a   : > { %p18_p2 = scmp.ge.s32.totalorder %s21_s14, 4   ;;  %s1030_s10 = smov %s729_s11 }
 0x18b   : > { %s1031_s11 = smov %s817_s23  ;;  %s1032_s12 = smov %s737_s13 }
 0x18c   : > { %s1033_s13 = smov %s1035_s17  ;;  %20 = sbr.rel (!%p18_p2) target bundleno = 8 (0x8), region = 86 }
 0x193   :  { %395 = vsyncpa [#allocation3], 1 }
 0x194   :  { %397 = vsyncpa [#allocation3 + $0x1], 1 }
 0x195   :  { %398 = vsyncpa [#allocation6], 1 }
 0x196   :  { %400 = vsyncpa [#allocation6 + $0x1], 1 }
 0x197   :  { %401 = vsyncpa [#allocation4], 1 }
 0x198   :  { %403 = vsyncpa [#allocation4 + $0x1], 1 }

</bundles_post_ra>
